<compile_context>
chip_gen: v7x
topology: tpu7x:2x2x1
jax: 0.10.0
libtpu: 0.0.40
codegen_flags: <defaults>
</compile_context>

<pallas_src>
import functools

import jax
import jax.numpy as jnp
from jax.experimental import pallas as pl
from jax.experimental.pallas import tpu as pltpu


def _conv3x3_kernel(x_ref, w_ref, b_ref, out_ref, *, row_stride):
    """One (batch, row-tile) step: 3x3 conv as a single im2col MXU matmul.

    x_ref  : (C_in, L)        VMEM  flattened padded rows of this tile,
                              L = (TH+2)*We + 2 tail elements
    w_ref  : (C_out, 9*C_in)  VMEM  im2col weights, column k = (dy*3+dx)*C_in+ci
    b_ref  : (C_out, 1)       VMEM  bias (f32)
    out_ref: (C_out, M)       VMEM  M = TH*We flattened (extended-width) pixels
    """
    m = out_ref.shape[1]

    # Tap (dy, dx) of flattened pixel q = y*We + x is x_flat[ci, q + dy*We + dx]:
    # a constant lane shift, so each tap is a single 2D ref slice, loaded once
    # and reused by every output channel through the matmul.
    taps = []
    for dy in range(3):
        for dx in range(3):
            start = dy * row_stride + dx
            taps.append(x_ref[:, start:start + m])          # (C_in, M)
    tap_mat = jnp.concatenate(taps, axis=0)                 # (9*C_in, M)

    # Single MXU contraction over K = 9*C_in with f32 accumulation.
    acc = jnp.dot(w_ref[...], tap_mat, preferred_element_type=jnp.float32)
    out_ref[...] = (acc + b_ref[...]).astype(out_ref.dtype)


def _plan_row_tiles(H, W, row_tile):
    """Choose (TH, We): row-tile height TH (divides H) and extended row width We.

    We >= W + 2 so each output row sees its left/right conv halo as a plain lane
    shift; when row-tiled (TH < H) we additionally require TH*We % 128 == 0 so
    every output block is lane-dense and a legal (8,128)-aligned block shape.
    """
    if row_tile is None:
        if H * W <= 64 * 1024:
            row_tile = H                       # whole image per step (small maps)
        else:                                  # bound per-step VMEM (v7x: 64 MiB/TC)
            row_tile = max((d for d in range(1, H + 1) if H % d == 0 and d <= 64),
                           default=H)
    th = int(row_tile)
    assert H % th == 0, "row_tile must divide H"
    we = W + 2
    if th != H:
        while (th * we) % 128 != 0:
            we += 1
    return th, we


def _vmem_limit_bytes():
    """Scoped-VMEM cap: generous on 128 MiB chips (v5e/v6e), safe on v7x (64 MiB)."""
    try:
        cap = int(pltpu.get_tpu_info().vmem_capacity_bytes)
    except Exception:
        cap = 64 * 1024 * 1024
    return int(min(96 * 1024 * 1024, max(32 * 1024 * 1024, (cap * 3) // 4)))


def conv3x3(x, weight, bias, *, use_refl=True, row_tile=None,
            compute_dtype=jnp.float32):
    """Pallas TPU forward of Conv3x3: pad-by-1 (reflect or zero) + 3x3 conv."""
    B, c_in, H, W = x.shape
    c_out = weight.shape[0]
    assert weight.shape == (c_out, c_in, 3, 3)
    assert bias.shape == (c_out,)
    assert H >= 2 and W >= 2, "reflection padding needs H, W >= 2"

    th, we = _plan_row_tiles(H, W, row_tile)
    r_tiles = H // th
    m = th * we                       # flattened (extended-width) pixels per tile
    lflat = (th + 2) * we + 2         # +2 tail keeps the dy=2/dx>0 taps in-bounds

    # Sublane-align the input-channel dim (zero channels x zero weights == 0).
    c_in_p = ((c_in + 7) // 8) * 8

    # --- Wrapper-side layout plumbing (pure data movement, no compute) -------
    pad_mode = "reflect" if use_refl else "constant"
    xc = jnp.pad(x.astype(compute_dtype),
                 ((0, 0), (0, c_in_p - c_in), (0, 0), (0, 0)))
    x_pad = jnp.pad(xc, ((0, 0), (0, 0), (1, 1), (1, 1)), mode=pad_mode)
    if we > W + 2:                    # extend rows so TH*We is lane-dense
        x_pad = jnp.pad(x_pad, ((0, 0), (0, 0), (0, 0), (0, we - (W + 2))))
    # Row tiles with a 1-row halo, rows flattened onto the lane dim, +2 tail.
    tiles = [x_pad[:, :, r * th:r * th + th + 2, :].reshape(B, c_in_p, (th + 2) * we)
             for r in range(r_tiles)]
    x_tiles = jnp.stack(tiles, axis=1)                          # (B, R, C_in_p, (TH+2)*We)
    x_tiles = jnp.pad(x_tiles, ((0, 0), (0, 0), (0, 0), (0, 2)))  # -> (..., L)

    # im2col weight matrix: w2[co, (dy*3+dx)*C_in_p + ci] = weight[co, ci, dy, dx]
    w_p = jnp.pad(weight.astype(compute_dtype),
                  ((0, 0), (0, c_in_p - c_in), (0, 0), (0, 0)))
    w2 = w_p.transpose(0, 2, 3, 1).reshape(c_out, 9 * c_in_p)
    b2 = bias.astype(jnp.float32).reshape(c_out, 1)

    kernel = functools.partial(_conv3x3_kernel, row_stride=we)
    out_ext = pl.pallas_call(
        kernel,
        out_shape=jax.ShapeDtypeStruct((B, c_out, r_tiles * m), jnp.float32),
        grid_spec=pltpu.PrefetchScalarGridSpec(
            num_scalar_prefetch=0,
            grid=(B, r_tiles),
            in_specs=[
                # One flattened row tile (+1-row halo) per grid step.
                pl.BlockSpec((pl.Squeezed(), pl.Squeezed(), c_in_p, lflat),
                             lambda b, r: (b, r, 0, 0)),
                # im2col weights + bias: resident VMEM tiles (same block every step).
                pl.BlockSpec((c_out, 9 * c_in_p), lambda b, r: (0, 0)),
                pl.BlockSpec((c_out, 1), lambda b, r: (0, 0)),
            ],
            out_specs=pl.BlockSpec((pl.Squeezed(), c_out, m),
                                   lambda b, r: (b, 0, r)),
        ),
        compiler_params=pltpu.CompilerParams(
            dimension_semantics=("parallel", "parallel"),
            vmem_limit_bytes=_vmem_limit_bytes(),
        ),
    )(x_tiles, w2, b2)

    # Drop the (We - W) garbage columns and restore (B, C_out, H, W).
    return out_ext.reshape(B, c_out, H, we)[:, :, :, :W]


def conv3x3_ref(x, weight, bias, *, use_refl=True):
    """Plain-JAX reference mirroring the PyTorch forward."""
    pad_mode = "reflect" if use_refl else "constant"
    xp = jnp.pad(x.astype(jnp.float32),
                 ((0, 0), (0, 0), (1, 1), (1, 1)), mode=pad_mode)
    out = jax.lax.conv_general_dilated(
        xp, weight.astype(jnp.float32),
        window_strides=(1, 1), padding="VALID",
        dimension_numbers=("NCHW", "OIHW", "NCHW"),
        precision=jax.lax.Precision.HIGHEST)
    return out + bias.astype(jnp.float32)[None, :, None, None]


if __name__ == "__main__":
    B, C_in, C_out, H, W = 2, 4, 8, 16, 16
    key = jax.random.PRNGKey(0)
    kx, kw, kb = jax.random.split(key, 3)

    x = jax.random.normal(kx, (B, C_in, H, W), dtype=jnp.float32)
    weight = 0.1 * jax.random.normal(kw, (C_out, C_in, 3, 3), dtype=jnp.float32)
    bias = 0.1 * jax.random.normal(kb, (C_out,), dtype=jnp.float32)

    ref_refl = conv3x3_ref(x, weight, bias, use_refl=True)
    ref_zero = conv3x3_ref(x, weight, bias, use_refl=False)

    # Whole-image tile (R == 1), reflection pad (module default).
    out1 = jax.block_until_ready(conv3x3(x, weight, bias, use_refl=True))
    assert out1.shape == (B, C_out, H, W)
    assert jnp.allclose(out1, ref_refl, atol=2e-3, rtol=2e-3)

    # Row-tiled path (R == 2): exercises the 1-row halo and the lane-dense
    # (multiple-of-128) output blocks plus both parallel grid axes.
    out2 = jax.block_until_ready(conv3x3(x, weight, bias, use_refl=True, row_tile=8))
    assert jnp.allclose(out2, ref_refl, atol=2e-3, rtol=2e-3)

    # Zero-pad variant (use_refl=False).
    out3 = jax.block_until_ready(conv3x3(x, weight, bias, use_refl=False))
    assert jnp.allclose(out3, ref_zero, atol=2e-3, rtol=2e-3)

    print("KERNEL_OK")
</pallas_src>

<mosaic_0001>
module attributes {stable_mosaic.version = 11 : i64} {
  func.func @_conv3x3_kernel(%arg0: i32, %arg1: i32, %arg2: memref<1x1x8x326xf32, #tpu.memory_space<vmem>>, %arg3: memref<8x72xf32, #tpu.memory_space<vmem>>, %arg4: memref<8x1xf32, #tpu.memory_space<vmem>>, %arg5: memref<1x8x288xf32, #tpu.memory_space<vmem>>) attributes {dimension_semantics = [#tpu.dimension_semantics<parallel>, #tpu.dimension_semantics<parallel>], iteration_bounds = array<i64: 2, 1>, scalar_prefetch = 0 : i64, scratch_operands = 0 : i64, tpu.core_type = #tpu.core_type<tc>, window_params = [{transform_indices = @transform_0, window_bounds = array<i64: 1, 1, 8, 326>}, {pipeline_mode = #tpu.pipeline_mode<synchronous>, transform_indices = @transform_1, window_bounds = array<i64: 8, 72>}, {pipeline_mode = #tpu.pipeline_mode<synchronous>, transform_indices = @transform_2, window_bounds = array<i64: 8, 1>}, {transform_indices = @transform_3, window_bounds = array<i64: 1, 8, 288>}]} {
    %c0 = arith.constant 0 : index
    %c0_0 = arith.constant 0 : index
    %c0_1 = arith.constant 0 : index
    %c0_2 = arith.constant 0 : index
    %0 = vector.load %arg2[%c0, %c0_0, %c0_1, %c0_2] : memref<1x1x8x326xf32, #tpu.memory_space<vmem>>, vector<1x1x8x288xf32>
    %1 = vector.shape_cast %0 : vector<1x1x8x288xf32> to vector<8x288xf32>
    %c0_3 = arith.constant 0 : index
    %c0_4 = arith.constant 0 : index
    %c0_5 = arith.constant 0 : index
    %c1 = arith.constant 1 : index
    %2 = vector.load %arg2[%c0_3, %c0_4, %c0_5, %c1] : memref<1x1x8x326xf32, #tpu.memory_space<vmem>>, vector<1x1x8x288xf32>
    %3 = vector.shape_cast %2 : vector<1x1x8x288xf32> to vector<8x288xf32>
    %c0_6 = arith.constant 0 : index
    %c0_7 = arith.constant 0 : index
    %c0_8 = arith.constant 0 : index
    %c2 = arith.constant 2 : index
    %4 = vector.load %arg2[%c0_6, %c0_7, %c0_8, %c2] : memref<1x1x8x326xf32, #tpu.memory_space<vmem>>, vector<1x1x8x288xf32>
    %5 = vector.shape_cast %4 : vector<1x1x8x288xf32> to vector<8x288xf32>
    %c0_9 = arith.constant 0 : index
    %c0_10 = arith.constant 0 : index
    %c0_11 = arith.constant 0 : index
    %c18 = arith.constant 18 : index
    %6 = vector.load %arg2[%c0_9, %c0_10, %c0_11, %c18] : memref<1x1x8x326xf32, #tpu.memory_space<vmem>>, vector<1x1x8x288xf32>
    %7 = vector.shape_cast %6 : vector<1x1x8x288xf32> to vector<8x288xf32>
    %c0_12 = arith.constant 0 : index
    %c0_13 = arith.constant 0 : index
    %c0_14 = arith.constant 0 : index
    %c19 = arith.constant 19 : index
    %8 = vector.load %arg2[%c0_12, %c0_13, %c0_14, %c19] : memref<1x1x8x326xf32, #tpu.memory_space<vmem>>, vector<1x1x8x288xf32>
    %9 = vector.shape_cast %8 : vector<1x1x8x288xf32> to vector<8x288xf32>
    %c0_15 = arith.constant 0 : index
    %c0_16 = arith.constant 0 : index
    %c0_17 = arith.constant 0 : index
    %c20 = arith.constant 20 : index
    %10 = vector.load %arg2[%c0_15, %c0_16, %c0_17, %c20] : memref<1x1x8x326xf32, #tpu.memory_space<vmem>>, vector<1x1x8x288xf32>
    %11 = vector.shape_cast %10 : vector<1x1x8x288xf32> to vector<8x288xf32>
    %c0_18 = arith.constant 0 : index
    %c0_19 = arith.constant 0 : index
    %c0_20 = arith.constant 0 : index
    %c36 = arith.constant 36 : index
    %12 = vector.load %arg2[%c0_18, %c0_19, %c0_20, %c36] : memref<1x1x8x326xf32, #tpu.memory_space<vmem>>, vector<1x1x8x288xf32>
    %13 = vector.shape_cast %12 : vector<1x1x8x288xf32> to vector<8x288xf32>
    %c0_21 = arith.constant 0 : index
    %c0_22 = arith.constant 0 : index
    %c0_23 = arith.constant 0 : index
    %c37 = arith.constant 37 : index
    %14 = vector.load %arg2[%c0_21, %c0_22, %c0_23, %c37] : memref<1x1x8x326xf32, #tpu.memory_space<vmem>>, vector<1x1x8x288xf32>
    %15 = vector.shape_cast %14 : vector<1x1x8x288xf32> to vector<8x288xf32>
    %c0_24 = arith.constant 0 : index
    %c0_25 = arith.constant 0 : index
    %c0_26 = arith.constant 0 : index
    %c38 = arith.constant 38 : index
    %16 = vector.load %arg2[%c0_24, %c0_25, %c0_26, %c38] : memref<1x1x8x326xf32, #tpu.memory_space<vmem>>, vector<1x1x8x288xf32>
    %17 = vector.shape_cast %16 : vector<1x1x8x288xf32> to vector<8x288xf32>
    %18 = tpu.concatenate %1, %3, %5, %7, %9, %11, %13, %15, %17 in 0 : vector<8x288xf32>, vector<8x288xf32>, vector<8x288xf32>, vector<8x288xf32>, vector<8x288xf32>, vector<8x288xf32>, vector<8x288xf32>, vector<8x288xf32>, vector<8x288xf32> -> vector<72x288xf32>
    %c0_27 = arith.constant 0 : index
    %c0_28 = arith.constant 0 : index
    %19 = vector.load %arg3[%c0_27, %c0_28] : memref<8x72xf32, #tpu.memory_space<vmem>>, vector<8x72xf32>
    %cst = arith.constant dense<0.000000e+00> : vector<8x288xf32>
    %20 = tpu.matmul %19, %18, %cst {dimension_numbers = #tpu.dot_dimension_numbers<[1], [0], [0], [1], [0, 0, 1, 1], [], []>} : vector<8x72xf32>, vector<72x288xf32>, vector<8x288xf32> -> vector<8x288xf32>
    %c0_29 = arith.constant 0 : index
    %c0_30 = arith.constant 0 : index
    %21 = vector.load %arg4[%c0_29, %c0_30] : memref<8x1xf32, #tpu.memory_space<vmem>>, vector<8x1xf32>
    %22 = vector.broadcast %21 : vector<8x1xf32> to vector<8x288xf32>
    %23 = arith.addf %20, %22 : vector<8x288xf32>
    %c0_31 = arith.constant 0 : index
    %c0_32 = arith.constant 0 : index
    %c0_33 = arith.constant 0 : index
    %24 = vector.load %arg5[%c0_31, %c0_32, %c0_33] : memref<1x8x288xf32, #tpu.memory_space<vmem>>, vector<1x8x288xf32>
    %25 = vector.shape_cast %24 : vector<1x8x288xf32> to vector<8x288xf32>
    %26 = vector.shape_cast %23 : vector<8x288xf32> to vector<1x8x288xf32>
    tpu.vector_store %arg5[%c0_31, %c0_32, %c0_33], %26 {strides = array<i32>} : memref<1x8x288xf32, #tpu.memory_space<vmem>>, vector<1x8x288xf32>,
    return
  }
  func.func @transform_0(%arg0: i32, %arg1: i32) -> (i32, i32, i32, i32) {
    %c0_i32 = arith.constant 0 : i32
    %c0_i32_0 = arith.constant 0 : i32
    %c0_i32_1 = arith.constant 0 : i32
    return %arg0, %arg1, %c0_i32, %c0_i32_0 : i32, i32, i32, i32
  }
  func.func @transform_1(%arg0: i32, %arg1: i32) -> (i32, i32) {
    %c0_i32 = arith.constant 0 : i32
    %c0_i32_0 = arith.constant 0 : i32
    %c0_i32_1 = arith.constant 0 : i32
    return %c0_i32, %c0_i32_0 : i32, i32
  }
  func.func @transform_2(%arg0: i32, %arg1: i32) -> (i32, i32) {
    %c0_i32 = arith.constant 0 : i32
    %c0_i32_0 = arith.constant 0 : i32
    %c0_i32_1 = arith.constant 0 : i32
    return %c0_i32, %c0_i32_0 : i32, i32
  }
  func.func @transform_3(%arg0: i32, %arg1: i32) -> (i32, i32, i32) {
    %c0_i32 = arith.constant 0 : i32
    %c0_i32_0 = arith.constant 0 : i32
    return %arg0, %c0_i32, %arg1 : i32, i32, i32
  }
}

</mosaic_0001>

<bundles_post_ra>
// kernel: tpu_custom_call.1
= control target key start
LH: loop header
LB: loop body
LE: loop exit
PB: predicated region body
PF: predicated region fallthrough
CT: control target
= control target key end

     0   :  { %8 = vsyncpa [#allocation3], 0  ;;  %s1089_s0 = inlined_call_operand.hbm [shape: f32[2,1,8,326], index: 0, kind: input, shape index: {}]   ;;  %s1090_s1 = inlined_call_operand.vmem [shape: f32[8,72], index: 1, kind: input, shape index: {}]   ;;  %s1091_s2 = inlined_call_operand.vmem [shape: f32[8,1], index: 2, kind: input, shape index: {}]   ;;  %s1092_s3 = inlined_call_operand.hbm [shape: f32[2,8,288], index: 3, kind: output, shape index: {}]  }
   0x1   :  { %10 = vsyncpa [#allocation3 + $0x1], 0 }
   0x2   :  { %11 = vsyncpa [#allocation4], 0 }
   0x3   :  { %13 = vsyncpa [#allocation4 + $0x1], 0  ;;  %s898_s12 = smov 0   ;;  %s900_s13 = smov 0  }
   0x4   :  { %s902_s14 = smov 0   ;;  %s904_s15 = smov 0  }
   0x5   :  { %s906_s16 = smov 0   ;;  %s908_s17 = smov 0  }
   0x6 LB: > { %s565_s18 = sadd.s32 4294967295, %s862_s17   ;;  %s566_s19 = sadd.s32 4294967294, %s862_s17   ;;  %s862_s17 = sphi %s908_s17, %s19_s17   ;;  %s858_s16 = sphi %s906_s16, %s1107_s16   ;;  %s854_s15 = sphi %s904_s15, %s1106_s15   ;;  %s850_s14 = sphi %s902_s14, %s1105_s14   ;;  %s846_s13 = sphi %s900_s13, %s1104_s13   ;;  %s842_s12 = sphi %s898_s12, %s1103_s12  }
   0x7   : > { %s31_s20 = sadd.s32 1, %s858_s16  ;;  %s40_s21 = sadd.s32 1, %s850_s14 }
   0x8   : > { %p33_p0 = scmp.ge.s32.totalorder %s31_s20, 2  ;;  %p47_p1 = scmp.ne.s32.totalorder %s850_s14, %s846_s13 }
   0x9   : > { %p48_p2 = scmp.eq.s32.totalorder %s862_s17, 0  ;;  %p53_p3 = scmp.ne.s32.totalorder %s846_s13, %s842_s12 }
   0xa   : > { %s1109_s20 = smov (%p33_p0, %s31_s20), 0  ;;  %p54_p5 = scmp.eq.s32.totalorder %s565_s18, 0 }
   0xb   : > { %p939_p4 = por %p48_p2, %p47_p1  ;;  %s35_s23 = ssub.s32 %s858_s16, %s1109_s20 }
   0xc   : > { %p121_p6 = scmp.eq.s32.totalorder %s565_s18, 1  ;;  %p38_p7 = scmp.eq.s32.totalorder %s35_s23, 0 }
   0xd   : > { %p945_p8 = por %p54_p5, %p53_p3  ;;  %p127_p10 = scmp.eq.s32.totalorder %s566_s19, 1 }
   0xe   : > { %p949_p9 = por %p121_p6, %p47_p1  ;;  %p651_p13 = scmp.lt.s32.totalorder %s862_s17, 2 }
   0xf   : > { %s954_s26 = scalar_select %p38_p7, %s850_s14, %s40_s21  }
  0x10   : > { %s1096_s25 = scalar_select %p949_p9, 1, 0 }
  0x11   : > { %p956_p11 = por %p127_p10, %p53_p3  ;;  %s153_s28 = sand.u32 1, %s850_s14  }
  0x12   : > { %s635_s29 = smul.u32 24, %s153_s28  ;;  %p966_p0 = pnand %p651_p13, %p939_p4 }
  0x13   : > { %s1097_s27 = scalar_select %p956_p11, 1, 0 }
  0x14   : > { %s636_s30 = smul.u32 384, %s858_s16  ;;  %s157_s8 = scalar_lea.vmem [#allocation2], %s635_s29 }
  0x15   : > { %s167_s9 = sshll.u32 %s157_s8, 4  ;;  %s154_s10 = scalar_lea.sflag [#allocation3], %s153_s28  ;;  %s976_s9 = int_to_ptr.vmem [resolvable:$true] %s167_s9 }
  0x16   : > { %s974_s7 = scalar_lea.hbm %s1089_s0, %s636_s30  ;;  %p752_p3 = pneg %p966_p0 }
  0x17   : > { %s750_s11 = scalar_lea.hbm %s974_s7, 384  ;;  %s755_s21 = scalar_lea.hbm %s1089_s0, 768 }
  0x18   : > { %p751_p2 = scmp.ne.s32.totalorder %s974_s7, %s750_s11  ;;  %p756_p6 = scmp.lt.u32.totalorder %s974_s7, %s1089_s0 }
  0x19   : > { %p757_p7 = scmp.lt.u32.totalorder %s755_s21, %s750_s11  ;;  %p759_p13 = scmp.lt.u32.totalorder %s750_s11, %s974_s7 }
  0x1a   : > { %p753_p4 = pnand %p752_p3, %p751_p2 }
  0x1b   : > { %p758_p10 = por %p757_p7, %p756_p6 }
  0x1c   : > { %p754_p5 = pneg %p753_p4 }
  0x1d   : > { %p760_p12 = por %p759_p13, %p758_p10 }
  0x1f   : > { %p761_p1 = pnand %p760_p12, %p754_p5 }
  0x21   : > { %764 = shalt.err (!%p761_p1)
}
  0x22   : > { %s765_s28 = scalar_lea.vmem %s976_s9, 384  ;;  %s864_s29 = smov [#allocation2]  }
  0x23   : > { %p766_p2 = scmp.ne.s32.totalorder %s976_s9, %s765_s28  ;;  %s770_s30 = sshll.u32 %s864_s29, 4  ;;  %s771_s30 = int_to_ptr.vmem [resolvable:$false] %s770_s30 }
  0x24   : > { %s772_s5 = scalar_lea.vmem %s771_s30, 768  ;;  %p773_p9 = scmp.lt.s32.totalorder %s976_s9, %s771_s30 }
  0x25   : > { %p768_p4 = pnand %p766_p2, %p752_p3  ;;  %p774_p6 = scmp.lt.s32.totalorder %s772_s5, %s765_s28 }
  0x27   : > { %p769_p11 = pneg %p768_p4  ;;  %p775_p7 = por %p774_p6, %p773_p9 }
  0x29   : > { %p776_p10 = pnand %p775_p7, %p769_p11 }
  0x2b   : > { %779 = shalt.err (!%p776_p10)
}
  0x2c   : > { %646 = dma.hbm_to_vmem [thread:$0]  (!%p966_p0), %s974_s7, 384, %s976_s9, %s154_s10  }
  0x2d   : > { %p172_p12 = scmp.lt.s32.totalorder %s862_s17, 3  ;;  %p1099_p1 = scmp.ge.s32.totalorder %s862_s17, 1 }
  0x2f   : > { %p173_p3 = pnand %p1099_p1, %p172_p12 }
  0x30   : > { %s1007_s6 = sand.u32 (!%p173_p3), 1, %s846_s13  }
  0x31   : > { %176 = sbr.rel (%p173_p3) target bundleno = 438 (0x1b6), region = 32  ;;  %s179_s11 = scalar_lea.sflag (!%p173_p3), [#allocation3], %s1007_s6 }
  0x32   : > { %s637_s8 = smul.u32 (!%p173_p3), 24, %s1007_s6 }
  0x34   : > { %s182_s4 = scalar_lea.vmem (!%p173_p3), [#allocation2], %s637_s8 }
  0x38   : > { %833 = dma.done.wait (%p945_p8), %s179_s11, 384  }
  0x39   : > { %835 = vsyncadd (%p945_p8), %s179_s11, 4294966912  ;;  %v865_v0 = vmov 0.0|0.0   ;;  %v207_v1 = vld [vmem:[%s182_s4 + $0x8] sm:$0xff]  ;;  %v208_v2 = vld [vmem:[%s182_s4 + $0x10] sm:$0xff]  ;;  %s866_s7 = smov 126   ;;  %s867_s9 = smov 127  }
  0x3a   : > { %623 = vmatprep.subr.bf16.mxu1 %v865_v0  ;;  %v718_v3 = vpack.i.bf16 %v208_v2, %v207_v1  ;;  %v206_v4 = vld [vmem:[%s182_s4] sm:$0xff]  ;;  %s868_s10 = smov 110   ;;  %s869_s18 = smov 108   ;;  %v871_v5 = vmov 0.0   ;;  %vm874_vm0 = vmmov 0   ;;  %v875_v6 = vmov 0  }
  0x3b   : > { %s870_s24 = smov 109   ;;  %383 = vmatprep.mubr.f32.mxu0 %v871_v5  ;;  %s872_s19 = smov 91   ;;  %604 = vmatprep.mubr.msk.f32.mxu1 %vm874_vm0, %v871_v5  ;;  %v309_v7 = vld [vmem:[%s1091_s2] sm:$0xff]  ;;  %vm218_vm1 = vcmask 1039360   ;;  %vm242_vm2 = vcmask 900096   ;;  %vm230_vm3 = vcmask 1031168  }
  0x3c   : > { %719 = vrot.lane.b32.xlu1 %v718_v3, %s866_s7  ;;  %714 = vrot.lane.b32.xlu0 %v718_v3, %s867_s9  ;;  %s873_s21 = smov 92   ;;  %s876_s22 = smov 90   ;;  %vm266_vm4 = vcmask 883712   ;;  %vm254_vm5 = vcmask 891904   ;;  %vm290_vm6 = vcmask 744448   ;;  %vm278_vm7 = vcmask 752640  }
  0x3d   : > { %748 = vset.pattern.permute.xlu1 %v875_v6  ;;  %749 = vset.pattern.permute.xlu0 %v875_v6  ;;  %vm302_vm8 = vcmask 736256   ;;  %v308_v62 = vld [vmem:[%s1090_s1] sm:$0xff]  ;;  %vm315_vm9 = vcmask 588800   ;;  %vm462_vm10 = vcmask 261120   ;;  %s204_s5 = scalar_lea.vmem [#allocation5], %s637_s8  ;;  %s638_s11 = smul.u32 384, %s854_s15 }
  0x3e   : > { %s481_s4 = sshll.u32 %s204_s5, 4  ;;  %s465_s8 = scalar_lea.sflag [#allocation4], %s1007_s6  ;;  %s1042_s4 = int_to_ptr.vmem [resolvable:$true] %s481_s4 }
  0x3f   : > { %p1100_p9 = scmp.ne.s32.totalorder %s1096_s25, 0  ;;  %s877_s15 = smov [#allocation5]  }
  0x40   : > { %724 = vrot.lane.b32.xlu1 %v718_v3, %s868_s10  ;;  %212 = vrot.lane.b32.xlu0 %v206_v4, %s867_s9 }
  0x44   : > { %236 = vrot.lane.b32.xlu1 %v206_v4, %s868_s10  ;;  %224 = vrot.lane.b32.xlu0 %v206_v4, %s866_s7  ;;  %s1040_s10 = scalar_lea.hbm %s1092_s3, %s638_s11 }
  0x48   : > { %734 = vrot.lane.b32.xlu1 %v718_v3, %s869_s18  ;;  %729 = vrot.lane.b32.xlu0 %v718_v3, %s870_s24 }
  0x4c   : > { %260 = vrot.lane.b32.xlu1 %v206_v4, %s869_s18  ;;  %248 = vrot.lane.b32.xlu0 %v206_v4, %s870_s24  ;;  %s780_s18 = scalar_lea.vmem %s1042_s4, 384  ;;  %s784_s24 = sshll.u32 %s877_s15, 4  ;;  %s785_s24 = int_to_ptr.vmem [resolvable:$false] %s784_s24 }
  0x4d   : > { %p781_p8 = scmp.ne.s32.totalorder %s1042_s4, %s780_s18  ;;  %p787_p5 = scmp.lt.s32.totalorder %s1042_s4, %s785_s24 }
  0x4f   : > { %p782_p11 = pnand %p781_p8, %p1100_p9 }
  0x50   : > { %744 = vrot.lane.b32.xlu1 %v718_v3, %s872_s19  ;;  %739 = vrot.lane.b32.xlu0 %v718_v3, %s873_s21 }
  0x51   : > { %p783_p0 = pneg %p782_p11 }
  0x54   : > { %284 = vrot.lane.b32.xlu1 %v206_v4, %s872_s19  ;;  %272 = vrot.lane.b32.xlu0 %v206_v4, %s873_s21  ;;  %s786_s19 = scalar_lea.vmem %s785_s24, 768 }
  0x55   : > { %p788_p13 = scmp.lt.s32.totalorder %s786_s19, %s780_s18 }
  0x57   : > { %p789_p2 = por %p788_p13, %p787_p5 }
  0x58   : > { %300 = vrot.lane.b32.xlu1 %v208_v2, %s876_s22  ;;  %298 = vrot.lane.b32.xlu0 %v207_v1, %s876_s22 }
  0x59   : > { %p790_p4 = pnand %p789_p2, %p783_p0 }
  0x5c   : > { %296 = vrot.lane.b32.xlu0 %v206_v4, %s876_s22  ;;  %312 = vperm.xlu1 %748, %v309_v7  }
  0xae   : > { %v720_v8 = vpop.permute.xlu1 %719  ;;  %v715_v9 = vpop.permute.xlu0 %714 }
  0xaf   : > { %v717_v10 = vunpack.i.h.bf16 %v715_v9  ;;  %v716_v11 = vunpack.i.l.bf16 %v715_v9  ;;  %v722_v12 = vunpack.i.h.bf16 %v720_v8  ;;  %v721_v13 = vunpack.i.l.bf16 %v720_v8 }
  0xb1   : > { %v624_v14 = vpack.c.bf16 %v717_v10, %v208_v2  ;;  %v220_v15 = vsel %vm218_vm1, %v716_v11, %v717_v10  ;;  %v232_v24 = vsel %vm230_vm3, %v721_v13, %v722_v12 }
  0xb2   : > { %v725_v16 = vpop.permute.xlu1 %724  ;;  %v213_v17 = vpop.permute.xlu0 %212  ;;  %v607_v18 = vpack.c.bf16 %v220_v15, %v207_v1 }
  0xb3   : > { %v727_v19 = vunpack.i.h.bf16 %v725_v16  ;;  %v726_v20 = vunpack.i.l.bf16 %v725_v16  ;;  %v219_v21 = vsel %vm218_vm1, %v213_v17, %v716_v11  ;;  %625 = vmatpush3.bf16.msra.mxu1 %v624_v14 }
  0xb4   : > { %608 = vmatprep.subr.bf16.mxu0 %v607_v18  ;;  %626 = vmatprep.subr.bf16.mxu1 %v865_v0  ;;  %v609_v22 = vpack.c.bf16 %v219_v21, %v206_v4 }
  0xb5   : > { %v627_v23 = vpack.c.bf16 %v727_v19, %v722_v12  ;;  %v244_v25 = vsel %vm242_vm2, %v726_v20, %v727_v19 }
  0xb6   : > { %v237_v26 = vpop.permute.xlu1 %236  ;;  %610 = vmatpush1.bf16.msra.mxu0 %v609_v22  ;;  %v225_v27 = vpop.permute.xlu0 %224  ;;  %v611_v28 = vpack.c.bf16 %v244_v25, %v232_v24 }
  0xb7   : > { %v243_v29 = vsel %vm242_vm2, %v237_v26, %v726_v20  ;;  %v231_v30 = vsel %vm230_vm3, %v225_v27, %v721_v13  ;;  %628 = vmatpush3.bf16.msra.mxu1 %v627_v23 }
  0xb8   : > { %v613_v31 = vpack.c.bf16 %v243_v29, %v231_v30  ;;  %612 = vmatprep.subr.bf16.mxu0 %v611_v28  ;;  %629 = vmatprep.subr.bf16.mxu1 %v865_v0 }
  0xba   : > { %v735_v32 = vpop.permute.xlu1 %734  ;;  %614 = vmatpush1.bf16.msra.mxu0 %v613_v31  ;;  %v730_v33 = vpop.permute.xlu0 %729 }
  0xbb   : > { %v737_v34 = vunpack.i.h.bf16 %v735_v32  ;;  %v736_v35 = vunpack.i.l.bf16 %v735_v32  ;;  %v732_v36 = vunpack.i.h.bf16 %v730_v33  ;;  %v731_v37 = vunpack.i.l.bf16 %v730_v33 }
  0xbd   : > { %v630_v38 = vpack.c.bf16 %v737_v34, %v732_v36  ;;  %v256_v39 = vsel %vm254_vm5, %v731_v37, %v732_v36  ;;  %v268_v40 = vsel %vm266_vm4, %v736_v35, %v737_v34 }
  0xbe   : > { %v261_v41 = vpop.permute.xlu1 %260  ;;  %v249_v42 = vpop.permute.xlu0 %248  ;;  %v615_v43 = vpack.c.bf16 %v268_v40, %v256_v39 }
  0xbf   : > { %v267_v44 = vsel %vm266_vm4, %v261_v41, %v736_v35  ;;  %v255_v45 = vsel %vm254_vm5, %v249_v42, %v731_v37  ;;  %631 = vmatpush3.bf16.msra.mxu1 %v630_v38 }
  0xc0   : > { %v617_v46 = vpack.c.bf16 %v267_v44, %v255_v45  ;;  %616 = vmatprep.subr.bf16.mxu0 %v615_v43  ;;  %632 = vmatprep.subr.bf16.mxu1 %v865_v0 }
  0xc2   : > { %v745_v47 = vpop.permute.xlu1 %744  ;;  %v740_v48 = vpop.permute.xlu0 %739  ;;  %618 = vmatpush1.bf16.msra.mxu0 %v617_v46 }
  0xc3   : > { %v747_v49 = vunpack.i.h.bf16 %v745_v47  ;;  %v746_v50 = vunpack.i.l.bf16 %v745_v47  ;;  %v742_v51 = vunpack.i.h.bf16 %v740_v48  ;;  %v741_v52 = vunpack.i.l.bf16 %v740_v48 }
  0xc5   : > { %v633_v53 = vpack.c.bf16 %v747_v49, %v742_v51  ;;  %v280_v54 = vsel %vm278_vm7, %v741_v52, %v742_v51  ;;  %v292_v55 = vsel %vm290_vm6, %v746_v50, %v747_v49 }
  0xc6   : > { %v285_v56 = vpop.permute.xlu1 %284  ;;  %v273_v57 = vpop.permute.xlu0 %272  ;;  %v619_v58 = vpack.c.bf16 %v292_v55, %v280_v54 }
  0xc7   : > { %v291_v59 = vsel %vm290_vm6, %v285_v56, %v746_v50  ;;  %v279_v60 = vsel %vm278_vm7, %v273_v57, %v741_v52  ;;  %634 = vmatpush3.bf16.msra.mxu1 %v633_v53 }
  0xc8   : > { %v621_v61 = vpack.c.bf16 %v291_v59, %v279_v60  ;;  %620 = vmatprep.subr.bf16.mxu0 %v619_v58  ;;  %602 = vmatprep.subr.mxu1 %v871_v5 }
  0xca   : > { %v301_v63 = vpop.permute.xlu1 %300  ;;  %v299_v0 = vpop.permute.xlu0 %298  ;;  %622 = vmatpush1.bf16.msra.mxu0 %v621_v61 }
  0xcb   : > { %v304_v1 = vsel %vm302_vm8, %v299_v0, %v301_v63  ;;  %603 = vmatpush3.msra.mxu1 %v301_v63 }
  0xcc   : > { %335 = vmatprep.subr.mxu0 %v304_v1  ;;  %605 = vmatmul.mubr.msk.f32.vlgmr.msra.gmra.mrb[0].mxu1 %vm315_vm9, %v308_v62 }
  0xce   : > { %v297_v2 = vpop.permute.xlu0 %296 }
  0xcf   : > { %v303_v3 = vsel %vm302_vm8, %v297_v2, %v299_v0 }
  0xd0   : > { %336 = vmatpush1.msra.mxu0 %v303_v3 }
  0xd1   : > { %571 = vmatmul.mubr.msk.f32.vlgmr.msra.gmra.mrb[0].mxu0 %vm315_vm9, %v308_v62 }
  0xdb   : > { %v313_v4 = vpop.permute.xlu1 %312 }
 0x19f   : > { %v456_v5 = vpop.f32.mrb[0].mxu1 }
 0x1a0   : > { %v457_v6 = vadd.f32 %v456_v5, %v313_v4  ;;  %v606_v7 = vpop.f32.mrb[1].mxu1 }
 0x1a2   : > { %463 = vst.msk [vmem:[%s204_s5 + $0x10] sm:$0xff] %vm462_vm10, %v457_v6 }
 0x1a4   : > { %v385_v8 = vpop.f32.mrb[0].mxu0 }
 0x1a5   : > { %v386_v9 = vadd.f32 %v385_v8, %v313_v4  ;;  %v387_v10 = vpop.f32.mrb[1].mxu0 }
 0x1a6   : > { %v388_v11 = vadd.f32 %v387_v10, %v313_v4 }
 0x1a7   : > { %460 = vst [vmem:[%s204_s5] sm:$0xff] %v386_v9 }
 0x1a8   : > { %461 = vst [vmem:[%s204_s5 + $0x8] sm:$0xff] %v388_v11 }
 0x1a9   : > { %793 = shalt.err (!%p790_p4)
}
 0x1aa   : > { %s794_s6 = scalar_lea.hbm %s1040_s10, 384  ;;  %s798_s23 = scalar_lea.hbm %s1092_s3, 768 }
 0x1ab   : > { %p795_p6 = scmp.ne.s32.totalorder %s1040_s10, %s794_s6  ;;  %p799_p12 = scmp.lt.u32.totalorder %s1040_s10, %s1092_s3 }
 0x1ac   : > { %p800_p1 = scmp.lt.u32.totalorder %s798_s23, %s794_s6  ;;  %p802_p8 = scmp.lt.u32.totalorder %s794_s6, %s1040_s10 }
 0x1ad   : > { %p796_p7 = pnand %p795_p6, %p1100_p9 }
 0x1ae   : > { %p801_p3 = por %p800_p1, %p799_p12 }
 0x1af   : > { %p797_p10 = pneg %p796_p7 }
 0x1b0   : > { %p803_p11 = por %p802_p8, %p801_p3 }
 0x1b2   : > { %p804_p0 = pnand %p803_p11, %p797_p10 }
 0x1b4   : > { %807 = shalt.err (!%p804_p0)
}
 0x1b5   : > { %641 = dma.vmem_to_hbm [thread:$0]  (%p1100_p9), %s1042_s4, 384, %s1040_s10, %s465_s8  }
 0x1b6 PF: > { %s493_s30 = sand.u32 1, %s842_s12   ;;  %p1101_p5 = scmp.ne.s32.totalorder %s1097_s27, 0 }
 0x1b7   : > { %p1102_p13 = scmp.ge.s32.totalorder %s862_s17, 2  ;;  %s494_s5 = scalar_lea.sflag [#allocation4], %s493_s30 }
 0x1b9   : > { %p648_p2 = pnand %p1102_p13, %p1101_p5 }
 0x1bb   : > { %837 = dma.done.wait (!%p648_p2), %s494_s5, 384  }
 0x1bc   : > { %839 = vsyncadd (!%p648_p2), %s494_s5, 4294966912  ;;  %s19_s17 = sadd.s32 1, %s862_s17   ;;  %s1103_s12 = smov %s846_s13 }
 0x1bd   : > { %p16_p4 = scmp.ge.s32.totalorder %s19_s17, 4   ;;  %s1104_s13 = smov %s850_s14 }
 0x1be   : > { %s1105_s14 = smov %s954_s26  ;;  %s1106_s15 = smov %s858_s16 }
 0x1bf   : > { %s1107_s16 = smov %s1109_s20  ;;  %18 = sbr.rel (!%p16_p4) target bundleno = 6 (0x6), region = 77 }
 0x1c6   :  { %499 = vsyncpa [#allocation3], 1 }
 0x1c7   :  { %501 = vsyncpa [#allocation3 + $0x1], 1 }
 0x1c8   :  { %502 = vsyncpa [#allocation4], 1 }
 0x1c9   :  { %504 = vsyncpa [#allocation4 + $0x1], 1 }

</bundles_post_ra>
